<compile_context>
chip_gen: v6e
topology: v6e:2x2x1
jax: 0.10.0
libtpu: 0.0.40
codegen_flags: <defaults>
</compile_context>

<pallas_src>
import functools

import jax
import jax.numpy as jnp
from jax.experimental import pallas as pl
from jax.experimental.pallas import tpu as pltpu

_LANE = 128    # lane width: last dim of every block kept lane-dense
_SUBLANE = 8   # sublane granularity for f32 row tiles


def _round_up(x, m):
    return ((x + m - 1) // m) * m


def _vdraw_kernel_train(x_ref, w_ref, b_ref, eps_ref,
                        xout_ref, zmean_ref, zvar_ref, *, out_p):
    # One fused MXU matmul for both Linear layers: (tn, in_p) @ (in_p, 2*out_p).
    z = jnp.dot(x_ref[...], w_ref[...], preferred_element_type=jnp.float32)
    z = z + b_ref[...]
    z_mean = z[:, :out_p]          # static, 128-aligned slices
    z_var = z[:, out_p:]
    zmean_ref[...] = z_mean.astype(zmean_ref.dtype)
    zvar_ref[...] = z_var.astype(zvar_ref.dtype)
    # Reparameterization trick (training): x_out = mean + exp(0.5 * var) * eps
    std = jnp.exp(0.5 * z_var)     # EUP transcendental (free slot vs VPU/MXU)
    xout_ref[...] = (z_mean + std * eps_ref[...]).astype(xout_ref.dtype)


def _vdraw_kernel_eval(x_ref, w_ref, b_ref, zmean_ref, zvar_ref, *, out_p):
    z = jnp.dot(x_ref[...], w_ref[...], preferred_element_type=jnp.float32)
    z = z + b_ref[...]
    zmean_ref[...] = z[:, :out_p].astype(zmean_ref.dtype)
    zvar_ref[...] = z[:, out_p:].astype(zvar_ref.dtype)
    # Eval mode: x_out == z_mean exactly; the wrapper aliases it (no 3rd writeback).


@functools.partial(jax.jit, static_argnames=("training", "block_n"))
def vdraw_block(x, w_mean, b_mean, w_var, b_var, eps=None, *,
                training=True, block_n=512):
    """Pallas implementation of VDrawBlock.forward.

    x:       (N, in_features)  float32
    w_mean:  (in_features, out_features)   (transposed PyTorch weight)
    b_mean:  (1, out_features)
    w_var:   (in_features, out_features)
    b_var:   (1, out_features)
    eps:     (N, out_features) standard-normal noise (only used when training)

    Returns (x_out, z_mean, z_var), each (N, out_features).
    """
    n, in_f = x.shape
    out_f = w_mean.shape[1]
    dtype = x.dtype

    # Lane-dense padding of feature dims; row tile a multiple of the sublane count.
    in_p = _round_up(in_f, _LANE)
    out_p = _round_up(out_f, _LANE)
    tn = _round_up(min(block_n, _round_up(n, _SUBLANE)), _SUBLANE)
    n_p = _round_up(n, tn)
    grid = (n_p // tn,)

    def pad2(a, rows, cols):
        return jnp.pad(a, ((0, rows - a.shape[0]), (0, cols - a.shape[1])))

    # Fuse the two Linear layers into one lane-dense weight slab / bias row.
    # (Optionally these could be cast to bf16 to halve DMA bytes; kept f32 here to
    #  preserve exact parity with the PyTorch module's f32 math.)
    w_fused = jnp.concatenate([pad2(w_mean, in_p, out_p),
                               pad2(w_var, in_p, out_p)], axis=1)   # (in_p, 2*out_p)
    b_fused = jnp.concatenate([pad2(b_mean, 1, out_p),
                               pad2(b_var, 1, out_p)], axis=1)      # (1, 2*out_p)
    x_pad = pad2(x, n_p, in_p)

    row_in_spec = pl.BlockSpec((tn, in_p), lambda i: (i, 0))
    row_out_spec = pl.BlockSpec((tn, out_p), lambda i: (i, 0))
    w_spec = pl.BlockSpec((in_p, 2 * out_p), lambda i: (0, 0))   # VMEM-resident
    b_spec = pl.BlockSpec((1, 2 * out_p), lambda i: (0, 0))      # VMEM-resident

    cparams = pltpu.CompilerParams(
        dimension_semantics=("parallel",),      # row-parallel -> both TCs on v7x
        vmem_limit_bytes=64 * 1024 * 1024,
    )

    if training:
        eps_pad = pad2(eps, n_p, out_p)
        out_shape = (
            jax.ShapeDtypeStruct((n_p, out_p), dtype),   # x_out
            jax.ShapeDtypeStruct((n_p, out_p), dtype),   # z_mean
            jax.ShapeDtypeStruct((n_p, out_p), dtype),   # z_var
        )
        x_out, z_mean, z_var = pl.pallas_call(
            functools.partial(_vdraw_kernel_train, out_p=out_p),
            out_shape=out_shape,
            grid=grid,
            in_specs=[row_in_spec, w_spec, b_spec, row_out_spec],
            out_specs=(row_out_spec, row_out_spec, row_out_spec),
            compiler_params=cparams,
        )(x_pad, w_fused, b_fused, eps_pad)
        return (x_out[:n, :out_f], z_mean[:n, :out_f], z_var[:n, :out_f])
    else:
        out_shape = (
            jax.ShapeDtypeStruct((n_p, out_p), dtype),   # z_mean
            jax.ShapeDtypeStruct((n_p, out_p), dtype),   # z_var
        )
        z_mean, z_var = pl.pallas_call(
            functools.partial(_vdraw_kernel_eval, out_p=out_p),
            out_shape=out_shape,
            grid=grid,
            in_specs=[row_in_spec, w_spec, b_spec],
            out_specs=(row_out_spec, row_out_spec),
            compiler_params=cparams,
        )(x_pad, w_fused, b_fused)
        z_mean = z_mean[:n, :out_f]
        z_var = z_var[:n, :out_f]
        # x_out == z_mean in eval mode: alias instead of a redundant kernel output.
        return (z_mean, z_mean, z_var)


def _init_linear_params(key, in_features, out_features):
    """Deterministic init mimicking torch.nn.Linear default (uniform +-1/sqrt(in))."""
    kw, kb = jax.random.split(key)
    bound = 1.0 / jnp.sqrt(float(in_features))
    # stored as (in, out), i.e. transposed vs PyTorch's (out, in)
    w = jax.random.uniform(kw, (in_features, out_features), jnp.float32, -bound, bound)
    b = jax.random.uniform(kb, (1, out_features), jnp.float32, -bound, bound)
    return w, b


if __name__ == "__main__":
    key = jax.random.PRNGKey(0)
    k_x, k_eps, k_m, k_v = jax.random.split(key, 4)

    # Small shapes consistent with the module; block_n=8 exercises a multi-step grid.
    N, IN_F, OUT_F = 32, 32, 32
    BLOCK_N = 8

    x = jax.random.normal(k_x, (N, IN_F), jnp.float32)
    # TODO(synk): epsilon ~ N(0,1) is drawn in the wrapper (torch does it inside forward).
    eps = jax.random.normal(k_eps, (N, OUT_F), jnp.float32)

    w_mean, b_mean = _init_linear_params(k_m, IN_F, OUT_F)
    w_var, b_var = _init_linear_params(k_v, IN_F, OUT_F)

    # Training-mode forward (reparameterization trick).
    x_out, z_mean, z_var = vdraw_block(
        x, w_mean, b_mean, w_var, b_var, eps, training=True, block_n=BLOCK_N
    )
    jax.block_until_ready((x_out, z_mean, z_var))

    # Eval-mode forward (x_out == z_mean).
    x_out_e, z_mean_e, z_var_e = vdraw_block(
        x, w_mean, b_mean, w_var, b_var, eps, training=False, block_n=BLOCK_N
    )
    jax.block_until_ready((x_out_e, z_mean_e, z_var_e))

    # Reference check in plain JAX.
    zm_ref = x @ w_mean + b_mean
    zv_ref = x @ w_var + b_var
    xo_ref = zm_ref + jnp.exp(0.5 * zv_ref) * eps
    assert jnp.allclose(z_mean, zm_ref, atol=1e-4), "z_mean mismatch"
    assert jnp.allclose(z_var, zv_ref, atol=1e-4), "z_var mismatch"
    assert jnp.allclose(x_out, xo_ref, atol=1e-4), "x_out (train) mismatch"
    assert jnp.allclose(x_out_e, zm_ref, atol=1e-4), "x_out (eval) mismatch"
    assert jnp.allclose(z_mean_e, zm_ref, atol=1e-4), "z_mean (eval) mismatch"
    assert jnp.allclose(z_var_e, zv_ref, atol=1e-4), "z_var (eval) mismatch"

    print("KERNEL_OK")
</pallas_src>

<mosaic_0001>
module attributes {stable_mosaic.version = 11 : i64} {
  func.func @_vdraw_kernel_train(%arg0: i32, %arg1: memref<8x128xf32, #tpu.memory_space<vmem>>, %arg2: memref<128x256xf32, #tpu.memory_space<vmem>>, %arg3: memref<1x256xf32, #tpu.memory_space<vmem>>, %arg4: memref<8x128xf32, #tpu.memory_space<vmem>>, %arg5: memref<8x128xf32, #tpu.memory_space<vmem>>, %arg6: memref<8x128xf32, #tpu.memory_space<vmem>>, %arg7: memref<8x128xf32, #tpu.memory_space<vmem>>) attributes {dimension_semantics = [#tpu.dimension_semantics<parallel>], iteration_bounds = array<i64: 4>, scalar_prefetch = 0 : i64, scratch_operands = 0 : i64, tpu.core_type = #tpu.core_type<tc>, window_params = [{transform_indices = @transform_0, window_bounds = array<i64: 8, 128>}, {pipeline_mode = #tpu.pipeline_mode<synchronous>, transform_indices = @transform_1, window_bounds = array<i64: 128, 256>}, {pipeline_mode = #tpu.pipeline_mode<synchronous>, transform_indices = @transform_2, window_bounds = array<i64: 1, 256>}, {transform_indices = @transform_3, window_bounds = array<i64: 8, 128>}, {transform_indices = @transform_4, window_bounds = array<i64: 8, 128>}, {transform_indices = @transform_5, window_bounds = array<i64: 8, 128>}, {transform_indices = @transform_6, window_bounds = array<i64: 8, 128>}]} {
    %c0 = arith.constant 0 : index
    %c0_0 = arith.constant 0 : index
    %0 = vector.load %arg1[%c0, %c0_0] : memref<8x128xf32, #tpu.memory_space<vmem>>, vector<8x128xf32>
    %c0_1 = arith.constant 0 : index
    %c0_2 = arith.constant 0 : index
    %1 = vector.load %arg2[%c0_1, %c0_2] : memref<128x256xf32, #tpu.memory_space<vmem>>, vector<128x256xf32>
    %cst = arith.constant dense<0.000000e+00> : vector<8x256xf32>
    %2 = tpu.matmul %0, %1, %cst {dimension_numbers = #tpu.dot_dimension_numbers<[1], [0], [0], [1], [0, 0, 1, 1], [], []>} : vector<8x128xf32>, vector<128x256xf32>, vector<8x256xf32> -> vector<8x256xf32>
    %c0_3 = arith.constant 0 : index
    %c0_4 = arith.constant 0 : index
    %3 = vector.load %arg3[%c0_3, %c0_4] : memref<1x256xf32, #tpu.memory_space<vmem>>, vector<1x256xf32>
    %4 = vector.broadcast %3 : vector<1x256xf32> to vector<8x256xf32>
    %5 = arith.addf %2, %4 : vector<8x256xf32>
    %6 = vector.extract_strided_slice %5 {offsets = [0, 0], sizes = [8, 128], strides = [1, 1]} : vector<8x256xf32> to vector<8x128xf32>
    %7 = vector.extract_strided_slice %5 {offsets = [0, 128], sizes = [8, 128], strides = [1, 1]} : vector<8x256xf32> to vector<8x128xf32>
    %c0_5 = arith.constant 0 : index
    %c0_6 = arith.constant 0 : index
    %8 = vector.load %arg6[%c0_5, %c0_6] : memref<8x128xf32, #tpu.memory_space<vmem>>, vector<8x128xf32>
    tpu.vector_store %arg6[%c0_5, %c0_6], %6 {strides = array<i32>} : memref<8x128xf32, #tpu.memory_space<vmem>>, vector<8x128xf32>,
    %c0_7 = arith.constant 0 : index
    %c0_8 = arith.constant 0 : index
    %9 = vector.load %arg7[%c0_7, %c0_8] : memref<8x128xf32, #tpu.memory_space<vmem>>, vector<8x128xf32>
    tpu.vector_store %arg7[%c0_7, %c0_8], %7 {strides = array<i32>} : memref<8x128xf32, #tpu.memory_space<vmem>>, vector<8x128xf32>,
    %cst_9 = arith.constant 5.000000e-01 : f32
    %10 = vector.broadcast %cst_9 : f32 to vector<8x128xf32>
    %11 = arith.mulf %10, %7 : vector<8x128xf32>
    %12 = math.exp %11 : vector<8x128xf32>
    %c0_10 = arith.constant 0 : index
    %c0_11 = arith.constant 0 : index
    %13 = vector.load %arg4[%c0_10, %c0_11] : memref<8x128xf32, #tpu.memory_space<vmem>>, vector<8x128xf32>
    %14 = arith.mulf %12, %13 : vector<8x128xf32>
    %15 = arith.addf %6, %14 : vector<8x128xf32>
    %c0_12 = arith.constant 0 : index
    %c0_13 = arith.constant 0 : index
    %16 = vector.load %arg5[%c0_12, %c0_13] : memref<8x128xf32, #tpu.memory_space<vmem>>, vector<8x128xf32>
    tpu.vector_store %arg5[%c0_12, %c0_13], %15 {strides = array<i32>} : memref<8x128xf32, #tpu.memory_space<vmem>>, vector<8x128xf32>,
    return
  }
  func.func @transform_0(%arg0: i32) -> (i32, i32) {
    %c0_i32 = arith.constant 0 : i32
    %c0_i32_0 = arith.constant 0 : i32
    return %arg0, %c0_i32 : i32, i32
  }
  func.func @transform_1(%arg0: i32) -> (i32, i32) {
    %c0_i32 = arith.constant 0 : i32
    %c0_i32_0 = arith.constant 0 : i32
    %c0_i32_1 = arith.constant 0 : i32
    return %c0_i32, %c0_i32_0 : i32, i32
  }
  func.func @transform_2(%arg0: i32) -> (i32, i32) {
    %c0_i32 = arith.constant 0 : i32
    %c0_i32_0 = arith.constant 0 : i32
    %c0_i32_1 = arith.constant 0 : i32
    return %c0_i32, %c0_i32_0 : i32, i32
  }
  func.func @transform_3(%arg0: i32) -> (i32, i32) {
    %c0_i32 = arith.constant 0 : i32
    %c0_i32_0 = arith.constant 0 : i32
    return %arg0, %c0_i32 : i32, i32
  }
  func.func @transform_4(%arg0: i32) -> (i32, i32) {
    %c0_i32 = arith.constant 0 : i32
    %c0_i32_0 = arith.constant 0 : i32
    return %arg0, %c0_i32 : i32, i32
  }
  func.func @transform_5(%arg0: i32) -> (i32, i32) {
    %c0_i32 = arith.constant 0 : i32
    %c0_i32_0 = arith.constant 0 : i32
    return %arg0, %c0_i32 : i32, i32
  }
  func.func @transform_6(%arg0: i32) -> (i32, i32) {
    %c0_i32 = arith.constant 0 : i32
    %c0_i32_0 = arith.constant 0 : i32
    return %arg0, %c0_i32 : i32, i32
  }
}

</mosaic_0001>

<bundles_post_ra>
// kernel: vdraw_block.1
= control target key start
LH: loop header
LB: loop body
LE: loop exit
PB: predicated region body
PF: predicated region fallthrough
CT: control target
= control target key end

     0   :  { %s1096_s0 = inlined_call_operand.vmem [shape: f32[32,128], index: 0, kind: input, shape index: {}]   ;;  %s1097_s1 = inlined_call_operand.vmem [shape: f32[128,256], index: 1, kind: input, shape index: {}]   ;;  %s1098_s2 = inlined_call_operand.vmem [shape: f32[1,256], index: 2, kind: input, shape index: {}]   ;;  %s1099_s3 = inlined_call_operand.vmem [shape: f32[32,128], index: 3, kind: input, shape index: {}]   ;;  %s1100_s4 = inlined_call_operand.hbm [shape: f32[32,128], index: 4, kind: output, shape index: {0}]   ;;  %s1101_s5 = inlined_call_operand.hbm [shape: f32[32,128], index: 5, kind: output, shape index: {1}]   ;;  %s1102_s6 = inlined_call_operand.hbm [shape: f32[32,128], index: 6, kind: output, shape index: {2}]  }
   0x1   :  { %1107 = sst [smem:[#allocation9_spill]] %s1096_s0 }
   0x2   :  { %12 = vsyncpa [#allocation3], 0 }
   0x3   :  { %14 = vsyncpa [#allocation3 + $0x1], 0 }
   0x4   :  { %15 = vsyncpa [#allocation5], 0 }
   0x5   :  { %17 = vsyncpa [#allocation5 + $0x1], 0  ;;  %s815_s21 = smov 0   ;;  %s817_s22 = smov 0  }
   0x6   :  { %s819_s23 = smov 0   ;;  %s821_s24 = smov 0  }
   0x7 LB: > { %s836_s25 = sadd.s32 4294967295, %s774_s24   ;;  %s1103_s26 = sadd.s32 4294967294, %s774_s24   ;;  %s774_s24 = sphi %s821_s24, %s1118_s24   ;;  %s770_s23 = sphi %s819_s23, %s1117_s23   ;;  %s766_s22 = sphi %s817_s22, %s1116_s22   ;;  %s762_s21 = sphi %s815_s21, %s1115_s21  }
   0x8   : > { %s840_s27 = sadd.s32 1, %s774_s24   ;;  %s124_s28 = sadd.s32 1, %s770_s23 }
   0x9   : > { %s121_s29 = ssub.s32 %s774_s24, %s840_s27  ;;  %p134_p0 = scmp.ne.s32.totalorder %s770_s23, %s766_s22 }
   0xa   : > { %p122_p1 = scmp.eq.s32.totalorder %s121_s29, 0  ;;  %p135_p2 = scmp.eq.s32.totalorder %s836_s25, 3 }
   0xb   : > { %p140_p3 = scmp.ne.s32.totalorder %s766_s22, %s762_s21  ;;  %p141_p4 = scmp.eq.s32.totalorder %s1103_s26, 3 }
   0xc   : > { %s853_s30 = scalar_select %p122_p1, %s770_s23, %s124_s28  }
   0xd   : > { %p855_p5 = por %p135_p2, %p134_p0  ;;  %p859_p6 = por %p141_p4, %p140_p3 }
   0xe   : > { %p592_p7 = scmp.ge.s32.totalorder %s774_s24, 1  ;;  %p231_p8 = scmp.lt.s32.totalorder %s774_s24, 5 }
  0x10   : > { %p232_p9 = pnand %p592_p7, %p231_p8 }
  0x11   : > { %p274_p10 = scmp.lt.s32.totalorder (!%p232_p9), %s836_s25, 3  ;;  %s1110_s0 = sld [smem:[#allocation9_spill]] (!%p232_p9) }
  0x12   : > { %235 = sbr.rel (%p232_p9) target bundleno = 318 (0x13e), region = 36  ;;  %s1104_s10 = sand.u32 (!%p232_p9), 1, %s766_s22  }
  0x13   : > { %s974_s11 = sshll.u32 (!%p232_p9), %s1104_s10, 3  ;;  %s412_s15 = sand.u32 (!%p232_p9), 1, %s836_s25  }
  0x14   : > { %s981_s16 = sshll.u32 (!%p232_p9), %s836_s25, 7  ;;  %s266_s17 = scalar_lea.vmem (!%p232_p9), [#allocation4], %s974_s11 }
  0x15   : > { %s1106_s19 = scalar_lea.vmem (!%p232_p9), [#allocation6], %s974_s11  ;;  %s993_s12 = scalar_lea.hbm (!%p232_p9), %s1101_s5, %s981_s16 }
  0x16   : > { %s457_s20 = sshll.u32 (!%p232_p9), %s1106_s19, 4  ;;  %s1004_s26 = scalar_lea.hbm (!%p232_p9), %s1102_s6, %s981_s16  ;;  %s998_s20 = int_to_ptr.vmem [resolvable:$true] %s457_s20 }
  0x17   : > { %v314_v0 = vld [vmem:[%s1097_s1 + $0xf8] sm:$0xff]  ;;  %v313_v1 = vld [vmem:[%s1097_s1 + $0xf0] sm:$0xff]  ;;  %v312_v2 = vld [vmem:[%s1097_s1 + $0xe8] sm:$0xff]  ;;  %v776_v4 = vmov 0.0   ;;  %s936_s13 = scalar_select %p274_p10, %s836_s25, 3  ;;  %v317_v34 = vlaneseq }
  0x18   : > { %327 = vmatprep.subr.mxu0 %v314_v0  ;;  %v311_v3 = vld [vmem:[%s1097_s1 + $0xe0] sm:$0xff]  ;;  %391 = vmatprep.mubr.f32.mxu0 %v776_v4  ;;  %v310_v5 = vld [vmem:[%s1097_s1 + $0xd8] sm:$0xff]  ;;  %v309_v6 = vld [vmem:[%s1097_s1 + $0xd0] sm:$0xff]  ;;  %s1006_s10 = scalar_lea.sflag [#allocation5], %s412_s15  ;;  %s777_s9 = smov [#allocation4]  }
  0x19   : > { %328 = vmatpush1.msra.mxu0 %v313_v1  ;;  %v308_v7 = vld [vmem:[%s1097_s1 + $0xc8] sm:$0xff]  ;;  %v307_v8 = vld [vmem:[%s1097_s1 + $0xc0] sm:$0xff]  ;;  %v306_v9 = vld [vmem:[%s1097_s1 + $0xb8] sm:$0xff]  ;;  %s1105_s29 = sshll.u32 %s936_s13, 3  ;;  %v318_v35 = vshrl.u32 %v317_v34, 7 }
  0x1a   : > { %329 = vmatprep.subr.mxu0 %v312_v2  ;;  %v305_v10 = vld [vmem:[%s1097_s1 + $0xb0] sm:$0xff]  ;;  %v304_v11 = vld [vmem:[%s1097_s1 + $0xa8] sm:$0xff]  ;;  %v303_v12 = vld [vmem:[%s1097_s1 + $0xa0] sm:$0xff]  ;;  %s277_s18 = scalar_lea.vmem %s1110_s0, %s1105_s29  ;;  %s662_s29 = sshll.u32 %s777_s9, 4  ;;  %s663_s29 = int_to_ptr.vmem [resolvable:$false] %s662_s29 }
  0x1b   : > { %330 = vmatpush1.msra.mxu0 %v311_v3  ;;  %v302_v13 = vld [vmem:[%s1097_s1 + $0x98] sm:$0xff]  ;;  %v301_v14 = vld [vmem:[%s1097_s1 + $0x90] sm:$0xff]  ;;  %v300_v15 = vld [vmem:[%s1097_s1 + $0x88] sm:$0xff]  ;;  %v319_v36 = vsub.s32 0, %v318_v35  ;;  %v323_v38 = vsub.s32 1, %v318_v35  ;;  %s664_s19 = scalar_lea.vmem %s663_s29, 256 }
  0x1c   : > { %331 = vmatprep.subr.mxu0 %v310_v5  ;;  %v299_v16 = vld [vmem:[%s1097_s1 + $0x80] sm:$0xff]  ;;  %v298_v17 = vld [vmem:[%s1097_s1 + $0x78] sm:$0xff]  ;;  %v297_v18 = vld [vmem:[%s1097_s1 + $0x70] sm:$0xff] }
  0x1d   : > { %332 = vmatpush1.msra.mxu0 %v309_v6  ;;  %v296_v19 = vld [vmem:[%s1097_s1 + $0x68] sm:$0xff]  ;;  %v295_v20 = vld [vmem:[%s1097_s1 + $0x60] sm:$0xff]  ;;  %v294_v21 = vld [vmem:[%s1097_s1 + $0x58] sm:$0xff] }
  0x1e   : > { %333 = vmatprep.subr.mxu0 %v308_v7  ;;  %v293_v22 = vld [vmem:[%s1097_s1 + $0x50] sm:$0xff]  ;;  %v292_v23 = vld [vmem:[%s1097_s1 + $0x48] sm:$0xff]  ;;  %v291_v24 = vld [vmem:[%s1097_s1 + $0x40] sm:$0xff] }
  0x1f   : > { %334 = vmatpush1.msra.mxu0 %v307_v8  ;;  %v290_v25 = vld [vmem:[%s1097_s1 + $0x38] sm:$0xff]  ;;  %v289_v26 = vld [vmem:[%s1097_s1 + $0x30] sm:$0xff]  ;;  %v288_v27 = vld [vmem:[%s1097_s1 + $0x28] sm:$0xff] }
  0x20   : > { %335 = vmatprep.subr.mxu0 %v306_v9  ;;  %v287_v28 = vld [vmem:[%s1097_s1 + $0x20] sm:$0xff]  ;;  %v286_v29 = vld [vmem:[%s1097_s1 + $0x18] sm:$0xff]  ;;  %v285_v30 = vld [vmem:[%s1097_s1 + $0x10] sm:$0xff] }
  0x21   : > { %336 = vmatpush1.msra.mxu0 %v305_v10  ;;  %v284_v31 = vld [vmem:[%s1097_s1 + $0x8] sm:$0xff]  ;;  %v283_v32 = vld [vmem:[%s1097_s1] sm:$0xff] }
  0x22   : > { %337 = vmatprep.subr.mxu0 %v304_v11  ;;  %v282_v33 = vld [vmem:[%s277_s18] sm:$0xff]  ;;  %s444_s18 = sshll.u32 %s266_s17, 4  ;;  %s995_s18 = int_to_ptr.vmem [resolvable:$true] %s444_s18 }
  0x23   : > { %338 = vmatpush1.msra.mxu0 %v303_v12  ;;  %v315_v37 = vld [vmem:[%s1098_s2] sm:$0x3]  ;;  %s658_s28 = scalar_lea.vmem %s995_s18, 128  ;;  %p665_p0 = scmp.lt.s32.totalorder %s995_s18, %s663_s29 }
  0x24   : > { %339 = vmatprep.subr.mxu0 %v302_v13  ;;  %v320_v39 = vrot.slane %v315_v37, %v319_v36  ;;  %v324_v40 = vrot.slane %v315_v37, %v323_v38  ;;  %p659_p11 = scmp.ne.s32.totalorder %s995_s18, %s658_s28  ;;  %p666_p1 = scmp.lt.s32.totalorder %s664_s19, %s658_s28 }
  0x25   : > { %340 = vmatpush1.msra.mxu0 %v301_v14 }
  0x26   : > { %341 = vmatprep.subr.mxu0 %v300_v15  ;;  %p660_p12 = pnand %p659_p11, %p855_p5  ;;  %p667_p2 = por %p666_p1, %p665_p0 }
  0x27   : > { %342 = vmatpush1.msra.mxu0 %v299_v16 }
  0x28   : > { %343 = vmatprep.subr.mxu0 %v298_v17  ;;  %p661_p13 = pneg %p660_p12 }
  0x29   : > { %344 = vmatpush1.msra.mxu0 %v297_v18 }
  0x2a   : > { %345 = vmatprep.subr.mxu0 %v296_v19  ;;  %p668_p3 = pnand %p667_p2, %p661_p13 }
  0x2b   : > { %346 = vmatpush1.msra.mxu0 %v295_v20 }
  0x2c   : > { %347 = vmatprep.subr.mxu0 %v294_v21 }
  0x2d   : > { %348 = vmatpush1.msra.mxu0 %v293_v22 }
  0x2e   : > { %349 = vmatprep.subr.mxu0 %v292_v23 }
  0x2f   : > { %350 = vmatpush1.msra.mxu0 %v291_v24 }
  0x30   : > { %351 = vmatprep.subr.mxu0 %v290_v25 }
  0x31   : > { %352 = vmatpush1.msra.mxu0 %v289_v26 }
  0x32   : > { %353 = vmatprep.subr.mxu0 %v288_v27 }
  0x33   : > { %354 = vmatpush1.msra.mxu0 %v287_v28 }
  0x34   : > { %355 = vmatprep.subr.mxu0 %v286_v29 }
  0x35   : > { %356 = vmatpush1.msra.mxu0 %v285_v30 }
  0x36   : > { %357 = vmatprep.subr.mxu0 %v284_v31 }
  0x37   : > { %358 = vmatpush1.msra.mxu0 %v283_v32 }
  0x38   : > { %392 = vmatmul.mubr.f32.vlgmr.msra.gmra.mxu0 %v282_v33 }
  0xf8   : > { %v393_v41 = vpop.f32.mrf.mxu0 }
  0xf9   : > { %v987_v42 = vadd.f32 %v393_v41, %v320_v39 }
  0xfa   : > { %v395_v43 = vpop.f32.mrf.mxu0 }
  0xfb   : > { %398 = vst [vmem:[%s266_s17] sm:$0xff] %v987_v42  ;;  %v396_v44 = vadd.f32 %v395_v43, %v324_v40 }
  0xfc   : > { %671 = shalt.err (!%p668_p3)
}
  0xfd   : > { %s672_s15 = scalar_lea.hbm %s993_s12, 128  ;;  %s676_s14 = scalar_lea.hbm %s1101_s5, 512 }
  0xfe   : > { %p673_p4 = scmp.ne.s32.totalorder %s993_s12, %s672_s15  ;;  %p677_p9 = scmp.lt.s32.totalorder %s993_s12, %s1101_s5 }
  0xff   : > { %p678_p10 = scmp.lt.s32.totalorder %s676_s14, %s672_s15 }
 0x100   : > { %p674_p7 = pnand %p673_p4, %p855_p5 }
 0x101   : > { %p679_p11 = por %p678_p10, %p677_p9 }
 0x102   : > { %p675_p8 = pneg %p674_p7 }
 0x104   : > { %p680_p12 = pnand %p679_p11, %p675_p8 }
 0x106   : > { %683 = shalt.err (!%p680_p12)
}
 0x107   : > { %607 = dma.vmem_to_hbm [thread:$0]  (%p855_p5), %s995_s18, 128, %s993_s12, %s1006_s10   ;;  %v400_v45 = vmul.f32 0.5, %v396_v44 }
 0x108   : > { %s1111_s29 = scalar_lea.vmem [#allocation6], %s974_s11  ;;  %s684_s0 = scalar_lea.vmem %s998_s20, 128 }
 0x109   : > { %399 = vst [vmem:[%s1111_s29] sm:$0xff] %v396_v44  ;;  %p685_p13 = scmp.ne.s32.totalorder %s998_s20, %s684_s0  ;;  %s778_s19 = smov [#allocation6]  }
 0x10a   : > { %s688_s28 = sshll.u32 %s778_s19, 4  ;;  %s689_s28 = int_to_ptr.vmem [resolvable:$false] %s688_s28 }
 0x10b   : > { %p686_p0 = pnand %p685_p13, %p855_p5  ;;  %s690_s15 = scalar_lea.vmem %s689_s28, 256 }
 0x10c   : > { %p691_p2 = scmp.lt.s32.totalorder %s998_s20, %s689_s28  ;;  %p692_p3 = scmp.lt.s32.totalorder %s690_s15, %s684_s0 }
 0x10d   : > { %p687_p1 = pneg %p686_p0 }
 0x10e   : > { %p693_p4 = por %p692_p3, %p691_p2 }
 0x110   : > { %p694_p7 = pnand %p693_p4, %p687_p1 }
 0x112   : > { %697 = shalt.err (!%p694_p7)
}
 0x113   : > { %s698_s18 = scalar_lea.hbm %s1004_s26, 128  ;;  %s702_s25 = scalar_lea.hbm %s1102_s6, 512 }
 0x114   : > { %p699_p8 = scmp.ne.s32.totalorder %s1004_s26, %s698_s18  ;;  %p703_p11 = scmp.lt.s32.totalorder %s1004_s26, %s1102_s6 }
 0x115   : > { %p704_p12 = scmp.lt.s32.totalorder %s702_s25, %s698_s18 }
 0x116   : > { %p700_p9 = pnand %p699_p8, %p855_p5 }
 0x117   : > { %p705_p13 = por %p704_p12, %p703_p11 }
 0x118   : > { %p701_p10 = pneg %p700_p9 }
 0x11a   : > { %p706_p0 = pnand %p705_p13, %p701_p10 }
 0x11c   : > { %709 = shalt.err (!%p706_p0)
}
 0x11d   : > { %608 = dma.vmem_to_hbm [thread:$0]  (%p855_p5), %s998_s20, 128, %s1004_s26, %s1006_s10   ;;  %v401_v46 = vmul.f32 1.442695, %v400_v45 }
 0x11e   : > { %s1112_s29 = sshll.u32 %s936_s13, 3  ;;  %s259_s15 = scalar_lea.vmem [#allocation2], %s974_s11 }
 0x11f   : > { %656 = vpow2.f32 %v401_v46  ;;  %s281_s28 = scalar_lea.vmem %s1099_s3, %s1112_s29  ;;  %s431_s18 = sshll.u32 %s259_s15, 4  ;;  %s432_s18 = int_to_ptr.vmem [resolvable:$true] %s431_s18 }
 0x120   : > { %v403_v47 = vld [vmem:[%s281_s28] sm:$0xff]  ;;  %s429_s25 = scalar_lea.hbm %s1100_s4, %s981_s16  ;;  %s1113_s26 = sand.u32 1, %s766_s22  }
 0x121   : > { %s408_s10 = scalar_lea.sflag [#allocation3], %s1113_s26  ;;  %s710_s13 = scalar_lea.vmem %s432_s18, 128 }
 0x122   : > { %p711_p1 = scmp.ne.s32.totalorder %s432_s18, %s710_s13  ;;  %s779_s20 = smov [#allocation2]  }
 0x123   : > { %s714_s14 = sshll.u32 %s779_s20, 4  ;;  %s715_s14 = int_to_ptr.vmem [resolvable:$false] %s714_s14 }
 0x124   : > { %p712_p2 = pnand %p711_p1, %p855_p5  ;;  %s716_s11 = scalar_lea.vmem %s715_s14, 256 }
 0x125   : > { %p717_p4 = scmp.lt.s32.totalorder %s432_s18, %s715_s14  ;;  %p718_p7 = scmp.lt.s32.totalorder %s716_s11, %s710_s13 }
 0x126   : > { %p713_p3 = pneg %p712_p2 }
 0x127   : > { %p719_p8 = por %p718_p7, %p717_p4 }
 0x129   : > { %p720_p9 = pnand %p719_p8, %p713_p3 }
 0x12c   : > { %v657_v48 = vpop.eup %656 }
 0x12d   : > { %v404_v49 = vmul.f32 %v657_v48, %v403_v47 }
 0x12f   : > { %v405_v50 = vadd.f32 %v404_v49, %v987_v42 }
 0x131   : > { %406 = vst [vmem:[%s259_s15] sm:$0xff] %v405_v50 }
 0x132   : > { %723 = shalt.err (!%p720_p9)
}
 0x133   : > { %s724_s9 = scalar_lea.hbm %s429_s25, 128  ;;  %s728_s0 = scalar_lea.hbm %s1100_s4, 512 }
 0x134   : > { %p725_p10 = scmp.ne.s32.totalorder %s429_s25, %s724_s9  ;;  %p729_p13 = scmp.lt.s32.totalorder %s429_s25, %s1100_s4 }
 0x135   : > { %p730_p0 = scmp.lt.s32.totalorder %s728_s0, %s724_s9 }
 0x136   : > { %p726_p11 = pnand %p725_p10, %p855_p5 }
 0x137   : > { %p731_p1 = por %p730_p0, %p729_p13 }
 0x138   : > { %p727_p12 = pneg %p726_p11 }
 0x13a   : > { %p732_p2 = pnand %p731_p1, %p727_p12 }
 0x13c   : > { %735 = shalt.err (!%p732_p2)
}
 0x13d   : > { %606 = dma.vmem_to_hbm [thread:$0]  (%p855_p5), %s432_s18, 128, %s429_s25, %s408_s10  }
 0x13e PF: > { %p622_p3 = scmp.ge.s32.totalorder %s774_s24, 2  ;;  %s469_s15 = sand.u32 1, %s762_s21  }
 0x13f   : > { %s470_s12 = scalar_lea.sflag [#allocation3], %s469_s15 }
 0x140   : > { %p613_p4 = pnand %p622_p3, %p859_p6 }
 0x142   : > { %p614_p7 = pneg %p613_p4 }
 0x144   : > { %753 = dma.done.wait (%p614_p7), %s470_s12, 128  }
 0x145   : > { %755 = vsyncadd (%p614_p7), %s470_s12, 4294967168  ;;  %s1114_s17 = sadd.s32 4294967294, %s774_s24  }
 0x146   : > { %s478_s26 = sand.u32 1, %s1114_s17  }
 0x147   : > { %s479_s13 = scalar_lea.sflag [#allocation5], %s478_s26 }
 0x148   : > { %757 = dma.done.wait (%p614_p7), %s479_s13, 256  }
 0x149   : > { %759 = vsyncadd (%p614_p7), %s479_s13, 4294967040  ;;  %p20_p5 = scmp.ge.s32.totalorder %s840_s27, 6   ;;  %s1115_s21 = smov %s766_s22 }
 0x14a   : > { %s1116_s22 = smov %s770_s23  ;;  %s1117_s23 = smov %s853_s30 }
 0x14b   : > { %s1118_s24 = smov %s840_s27  ;;  %22 = sbr.rel (!%p20_p5) target bundleno = 7 (0x7), region = 106 }
 0x150   :  { %493 = vsyncpa [#allocation3], 1 }
 0x151   :  { %495 = vsyncpa [#allocation3 + $0x1], 1 }
 0x152   :  { %496 = vsyncpa [#allocation5], 1 }
 0x153   :  { %498 = vsyncpa [#allocation5 + $0x1], 1 }

</bundles_post_ra>
